<compile_context>
chip_gen: v5e
topology: v5e:2x2
jax: 0.10.0
libtpu: 0.0.40
codegen_flags: <defaults>
</compile_context>

<pallas_src>
import functools

import jax
import jax.numpy as jnp
from jax import lax
from jax.experimental import pallas as pl
from jax.experimental.pallas import tpu as pltpu


def _rpn_kernel(x_ref, w_ref, b_ref, m_ref, reg_ref, cls_ref, *, Nb, W, HW, n_reg):
    """One grid step = Nb images, channel-major / flat-spatial layout.

    x_ref   : (Nb, Cin_pad, HW)   inputs; channels on sublanes, H*W on lanes
    w_ref   : (6A, 9*Cin_pad)     folded conv+head weight (rows = out channels)
    b_ref   : (6A, 1)             folded bias
    m_ref   : (9, 1, Nb*HW)       precomputed border-validity masks per tap
    reg_ref : (Nb, 4A, HW)
    cls_ref : (Nb, 2A, HW)
    """
    L = Nb * HW

    # Collapse the Nb images of this block into the lane axis: (Cin_pad, Nb*HW).
    if Nb == 1:
        x = x_ref[0]
    else:
        x = jnp.concatenate([x_ref[n] for n in range(Nb)], axis=1)

    # Build the 9-tap im2row matrix (9*Cin_pad, Nb*HW).  Each tap is the input
    # rolled by (dh, dw) (XLU lane rotation, effectively free) times a
    # precomputed 0/1 border mask (one VPU multiply).  Lanes that wrap across
    # an image boundary (or the array end) are exactly the out-of-bounds
    # positions, so the mask zeroes them.
    taps = []
    for kh in range(3):
        for kw in range(3):
            dh, dw = kh - 1, kw - 1
            s = dh * W + dw  # flat-index shift of this tap
            if s == 0:
                taps.append(x)  # center tap: no shift, always valid
                continue
            shifted = pltpu.roll(x, shift=(-s) % L, axis=1)
            taps.append(shifted * m_ref[kh * 3 + kw])  # (Cin_pad, L) * (1, L)
    im2row = jnp.concatenate(taps, axis=0)  # (9*Cin_pad, L)

    # Single MXU push per grid step; output is lane-dense (HW multiple of 128).
    out = jnp.dot(w_ref[...], im2row, preferred_element_type=jnp.float32)
    out = out + b_ref[...]  # (6A, 1) broadcast over lanes

    for n in range(Nb):
        lo = n * HW
        reg_ref[n] = out[:n_reg, lo:lo + HW].astype(reg_ref.dtype)
        cls_ref[n] = out[n_reg:, lo:lo + HW].astype(cls_ref.dtype)


def rpn_forward(x_nchw, params):
    """Pallas-backed forward.  x_nchw: (N, Cin, H, W) float32.

    Returns (reg, cls) with exactly the nn.Conv2d shapes:
      reg = (N, 4*A, H, W), cls = (N, 2*A, H, W).
    """
    wconv, bconv, wreg, breg, wcls, bcls = params
    N, Cin, H, W = x_nchw.shape
    HW = H * W
    reg_c = wreg.shape[-1]  # 4*A
    cls_c = wcls.shape[-1]  # 2*A
    C = reg_c + cls_c       # 6*A

    # ---- sublane-align Cin (pad input channels to a multiple of 8) ----------
    Cin_pad = max(8, 8 * pl.cdiv(Cin, 8))

    # ---- fold the (purely linear) 1x1 heads into the 3x3 conv (weights only,
    # no activation-sized HBM traffic) ---------------------------------------
    w_heads = jnp.concatenate([wreg, wcls], axis=1)  # (Cout, 6A)
    b_heads = jnp.concatenate([breg, bcls], axis=0)  # (6A,)
    wconv_p = wconv
    if Cin_pad != Cin:
        wconv_p = jnp.pad(wconv, ((0, 0), (0, 0), (0, Cin_pad - Cin), (0, 0)))
    # wfold_t[c, (kh*3+kw)*Cin_pad + i] = sum_o wconv[kh,kw,i,o] * w_heads[o,c]
    wfold_t = jnp.einsum("hwio,oc->chwi", wconv_p, w_heads).reshape(C, 9 * Cin_pad)
    bfold = (bconv @ w_heads + b_heads).reshape(C, 1)  # (6A, 1)

    # ---- batch coarsening: Nb images per grid step (amortize per-step cost),
    # but keep >= 2 parallel grid blocks for v7x's dual TensorCores ----------
    bytes_per_img = (Cin_pad + 9 * Cin_pad + 2 * C) * HW * 4  # in + im2row + out
    nb_cap = max(1, (8 * 1024 * 1024) // max(bytes_per_img, 1))
    Nb = min(pl.cdiv(N, 2), nb_cap)
    num_blocks = pl.cdiv(N, Nb)
    N_pad = num_blocks * Nb

    # ---- free reshape, plus (tiny) zero pads for channel/batch alignment ---
    x_flat = x_nchw.reshape(N, Cin, HW)
    if N_pad != N or Cin_pad != Cin:
        x_flat = jnp.pad(x_flat, ((0, N_pad - N), (0, Cin_pad - Cin), (0, 0)))

    # ---- precompute batch-invariant border-validity masks (9 taps) ---------
    L = Nb * HW
    hh = jnp.arange(HW, dtype=jnp.int32) // W
    ww = jnp.arange(HW, dtype=jnp.int32) % W
    rows = []
    for kh in range(3):
        for kw in range(3):
            dh, dw = kh - 1, kw - 1
            valid = ((hh + dh >= 0) & (hh + dh < H) &
                     (ww + dw >= 0) & (ww + dw < W))
            rows.append(valid.astype(jnp.float32))
    mask_hw = jnp.stack(rows, axis=0)                    # (9, HW)
    mask = jnp.tile(mask_hw, (1, Nb)).reshape(9, 1, L)   # (9, 1, Nb*HW)

    kernel = functools.partial(_rpn_kernel, Nb=Nb, W=W, HW=HW, n_reg=reg_c)

    reg_flat, cls_flat = pl.pallas_call(
        kernel,
        out_shape=(
            jax.ShapeDtypeStruct((N_pad, reg_c, HW), x_nchw.dtype),
            jax.ShapeDtypeStruct((N_pad, cls_c, HW), x_nchw.dtype),
        ),
        grid_spec=pltpu.PrefetchScalarGridSpec(
            num_scalar_prefetch=0,
            grid=(num_blocks,),
            in_specs=[
                pl.BlockSpec((Nb, Cin_pad, HW), lambda b: (b, 0, 0)),
                pl.BlockSpec((C, 9 * Cin_pad), lambda b: (0, 0)),
                pl.BlockSpec((C, 1), lambda b: (0, 0)),
                pl.BlockSpec((9, 1, L), lambda b: (0, 0, 0)),
            ],
            out_specs=[
                pl.BlockSpec((Nb, reg_c, HW), lambda b: (b, 0, 0)),
                pl.BlockSpec((Nb, cls_c, HW), lambda b: (b, 0, 0)),
            ],
        ),
        compiler_params=pltpu.CompilerParams(
            dimension_semantics=("parallel",),
            vmem_limit_bytes=32 * 1024 * 1024,
        ),
    )(x_flat, wfold_t, bfold, mask)

    # Drop batch padding; free reshapes back to the PyTorch NCHW output shapes.
    reg = reg_flat[:N].reshape(N, reg_c, H, W)
    cls = cls_flat[:N].reshape(N, cls_c, H, W)
    return reg, cls


def init_params(key, in_dim, out_dim, n_anchor):
    """Deterministic Kaiming-uniform-style init (synthetic, shapes as in __init__)."""
    k1, k2, k3, k4, k5, k6 = jax.random.split(key, 6)

    def kaiming_uniform(k, shape, fan_in):
        bound = jnp.sqrt(6.0 / fan_in)  # gain sqrt(2) * sqrt(3/fan_in)
        return jax.random.uniform(k, shape, jnp.float32, -bound, bound)

    # conv: 3x3, stored HWIO; reg/cls: 1x1 stored as (Cin, Cout) matmul weights.
    wconv = kaiming_uniform(k1, (3, 3, in_dim, out_dim), fan_in=in_dim * 9)
    wreg = kaiming_uniform(k2, (out_dim, n_anchor * 4), fan_in=out_dim)
    wcls = kaiming_uniform(k3, (out_dim, n_anchor * 2), fan_in=out_dim)
    # PyTorch Conv2d default bias init: U(-1/sqrt(fan_in), 1/sqrt(fan_in)).
    bconv = jax.random.uniform(k4, (out_dim,), jnp.float32,
                               -1.0 / jnp.sqrt(in_dim * 9.0),
                               1.0 / jnp.sqrt(in_dim * 9.0))
    breg = jax.random.uniform(k5, (n_anchor * 4,), jnp.float32,
                              -1.0 / jnp.sqrt(float(out_dim)),
                              1.0 / jnp.sqrt(float(out_dim)))
    bcls = jax.random.uniform(k6, (n_anchor * 2,), jnp.float32,
                              -1.0 / jnp.sqrt(float(out_dim)),
                              1.0 / jnp.sqrt(float(out_dim)))
    return wconv, bconv, wreg, breg, wcls, bcls


def _reference_forward(x_nchw, params):
    """Pure-JAX reference (lax.conv), mirrors nn.Conv2d exactly (no folding)."""
    wconv, bconv, wreg, breg, wcls, bcls = params
    w_oihw = jnp.transpose(wconv, (3, 2, 0, 1))  # HWIO -> OIHW
    feat = lax.conv_general_dilated(
        x_nchw, w_oihw, (1, 1), ((1, 1), (1, 1)),
        dimension_numbers=("NCHW", "OIHW", "NCHW")) + bconv[None, :, None, None]
    wreg_oihw = jnp.transpose(wreg, (1, 0))[:, :, None, None]
    wcls_oihw = jnp.transpose(wcls, (1, 0))[:, :, None, None]
    reg = lax.conv_general_dilated(
        feat, wreg_oihw, (1, 1), ((0, 0), (0, 0)),
        dimension_numbers=("NCHW", "OIHW", "NCHW")) + breg[None, :, None, None]
    cls = lax.conv_general_dilated(
        feat, wcls_oihw, (1, 1), ((0, 0), (0, 0)),
        dimension_numbers=("NCHW", "OIHW", "NCHW")) + bcls[None, :, None, None]
    return reg, cls


if __name__ == "__main__":
    # Small shapes consistent with RPN(in_dim=4, out_dim=32, in_size=16, n_anchor=3)
    in_dim, out_dim, in_size, n_anchor = 4, 32, 16, 3

    key = jax.random.PRNGKey(0)
    kp, kx1, kx2 = jax.random.split(key, 3)
    params = init_params(kp, in_dim, out_dim, n_anchor)

    fwd = jax.jit(rpn_forward)

    # Case 1: N=2 (Nb=1, two parallel blocks).  Case 2: N=5 (Nb=3, coarsened
    # blocks + batch padding + multi-image lane collapse exercised).
    for N, kx in ((2, kx1), (5, kx2)):
        x = jax.random.normal(kx, (N, in_dim, in_size, in_size), jnp.float32)
        reg, cls = fwd(x, params)
        reg = jax.block_until_ready(reg)
        cls = jax.block_until_ready(cls)

        assert reg.shape == (N, n_anchor * 4, in_size, in_size), reg.shape
        assert cls.shape == (N, n_anchor * 2, in_size, in_size), cls.shape

        # Correctness check against pure-JAX conv reference (folding only
        # changes f32 summation order, so the tolerance stays tight).
        reg_ref, cls_ref = _reference_forward(x, params)
        assert jnp.allclose(reg, reg_ref, atol=1e-3, rtol=1e-3)
        assert jnp.allclose(cls, cls_ref, atol=1e-3, rtol=1e-3)

    print("KERNEL_OK")
</pallas_src>

<mosaic_0001>
module attributes {stable_mosaic.version = 11 : i64} {
  func.func @_rpn_kernel(%arg0: i32, %arg1: memref<1x8x256xf32, #tpu.memory_space<vmem>>, %arg2: memref<18x72xf32, #tpu.memory_space<vmem>>, %arg3: memref<18x1xf32, #tpu.memory_space<vmem>>, %arg4: memref<9x1x256xf32, #tpu.memory_space<vmem>>, %arg5: memref<1x12x256xf32, #tpu.memory_space<vmem>>, %arg6: memref<1x6x256xf32, #tpu.memory_space<vmem>>) attributes {dimension_semantics = [#tpu.dimension_semantics<parallel>], iteration_bounds = array<i64: 2>, scalar_prefetch = 0 : i64, scratch_operands = 0 : i64, tpu.core_type = #tpu.core_type<tc>, window_params = [{transform_indices = @transform_0, window_bounds = array<i64: 1, 8, 256>}, {pipeline_mode = #tpu.pipeline_mode<synchronous>, transform_indices = @transform_1, window_bounds = array<i64: 18, 72>}, {pipeline_mode = #tpu.pipeline_mode<synchronous>, transform_indices = @transform_2, window_bounds = array<i64: 18, 1>}, {pipeline_mode = #tpu.pipeline_mode<synchronous>, transform_indices = @transform_3, window_bounds = array<i64: 9, 1, 256>}, {transform_indices = @transform_4, window_bounds = array<i64: 1, 12, 256>}, {transform_indices = @transform_5, window_bounds = array<i64: 1, 6, 256>}]} {
    %c0 = arith.constant 0 : index
    %c0_0 = arith.constant 0 : index
    %c0_1 = arith.constant 0 : index
    %0 = vector.load %arg1[%c0, %c0_0, %c0_1] : memref<1x8x256xf32, #tpu.memory_space<vmem>>, vector<1x8x256xf32>
    %1 = vector.shape_cast %0 : vector<1x8x256xf32> to vector<8x256xf32>
    %c17_i32 = arith.constant 17 : i32
    %2 = tpu.dynamic_rotate %1 by %c17_i32 dim 1 : vector<8x256xf32>, i32 -> vector<8x256xf32>
    %c0_2 = arith.constant 0 : index
    %c0_3 = arith.constant 0 : index
    %c0_4 = arith.constant 0 : index
    %3 = vector.load %arg4[%c0_2, %c0_3, %c0_4] : memref<9x1x256xf32, #tpu.memory_space<vmem>>, vector<1x1x256xf32>
    %4 = vector.shape_cast %3 : vector<1x1x256xf32> to vector<1x256xf32>
    %5 = vector.broadcast %4 : vector<1x256xf32> to vector<8x256xf32>
    %6 = arith.mulf %2, %5 : vector<8x256xf32>
    %c16_i32 = arith.constant 16 : i32
    %7 = tpu.dynamic_rotate %1 by %c16_i32 dim 1 : vector<8x256xf32>, i32 -> vector<8x256xf32>
    %c1 = arith.constant 1 : index
    %c0_5 = arith.constant 0 : index
    %c0_6 = arith.constant 0 : index
    %8 = vector.load %arg4[%c1, %c0_5, %c0_6] : memref<9x1x256xf32, #tpu.memory_space<vmem>>, vector<1x1x256xf32>
    %9 = vector.shape_cast %8 : vector<1x1x256xf32> to vector<1x256xf32>
    %10 = vector.broadcast %9 : vector<1x256xf32> to vector<8x256xf32>
    %11 = arith.mulf %7, %10 : vector<8x256xf32>
    %c15_i32 = arith.constant 15 : i32
    %12 = tpu.dynamic_rotate %1 by %c15_i32 dim 1 : vector<8x256xf32>, i32 -> vector<8x256xf32>
    %c2 = arith.constant 2 : index
    %c0_7 = arith.constant 0 : index
    %c0_8 = arith.constant 0 : index
    %13 = vector.load %arg4[%c2, %c0_7, %c0_8] : memref<9x1x256xf32, #tpu.memory_space<vmem>>, vector<1x1x256xf32>
    %14 = vector.shape_cast %13 : vector<1x1x256xf32> to vector<1x256xf32>
    %15 = vector.broadcast %14 : vector<1x256xf32> to vector<8x256xf32>
    %16 = arith.mulf %12, %15 : vector<8x256xf32>
    %c1_i32 = arith.constant 1 : i32
    %17 = tpu.dynamic_rotate %1 by %c1_i32 dim 1 : vector<8x256xf32>, i32 -> vector<8x256xf32>
    %c3 = arith.constant 3 : index
    %c0_9 = arith.constant 0 : index
    %c0_10 = arith.constant 0 : index
    %18 = vector.load %arg4[%c3, %c0_9, %c0_10] : memref<9x1x256xf32, #tpu.memory_space<vmem>>, vector<1x1x256xf32>
    %19 = vector.shape_cast %18 : vector<1x1x256xf32> to vector<1x256xf32>
    %20 = vector.broadcast %19 : vector<1x256xf32> to vector<8x256xf32>
    %21 = arith.mulf %17, %20 : vector<8x256xf32>
    %c255_i32 = arith.constant 255 : i32
    %22 = tpu.dynamic_rotate %1 by %c255_i32 dim 1 : vector<8x256xf32>, i32 -> vector<8x256xf32>
    %c5 = arith.constant 5 : index
    %c0_11 = arith.constant 0 : index
    %c0_12 = arith.constant 0 : index
    %23 = vector.load %arg4[%c5, %c0_11, %c0_12] : memref<9x1x256xf32, #tpu.memory_space<vmem>>, vector<1x1x256xf32>
    %24 = vector.shape_cast %23 : vector<1x1x256xf32> to vector<1x256xf32>
    %25 = vector.broadcast %24 : vector<1x256xf32> to vector<8x256xf32>
    %26 = arith.mulf %22, %25 : vector<8x256xf32>
    %c241_i32 = arith.constant 241 : i32
    %27 = tpu.dynamic_rotate %1 by %c241_i32 dim 1 : vector<8x256xf32>, i32 -> vector<8x256xf32>
    %c6 = arith.constant 6 : index
    %c0_13 = arith.constant 0 : index
    %c0_14 = arith.constant 0 : index
    %28 = vector.load %arg4[%c6, %c0_13, %c0_14] : memref<9x1x256xf32, #tpu.memory_space<vmem>>, vector<1x1x256xf32>
    %29 = vector.shape_cast %28 : vector<1x1x256xf32> to vector<1x256xf32>
    %30 = vector.broadcast %29 : vector<1x256xf32> to vector<8x256xf32>
    %31 = arith.mulf %27, %30 : vector<8x256xf32>
    %c240_i32 = arith.constant 240 : i32
    %32 = tpu.dynamic_rotate %1 by %c240_i32 dim 1 : vector<8x256xf32>, i32 -> vector<8x256xf32>
    %c7 = arith.constant 7 : index
    %c0_15 = arith.constant 0 : index
    %c0_16 = arith.constant 0 : index
    %33 = vector.load %arg4[%c7, %c0_15, %c0_16] : memref<9x1x256xf32, #tpu.memory_space<vmem>>, vector<1x1x256xf32>
    %34 = vector.shape_cast %33 : vector<1x1x256xf32> to vector<1x256xf32>
    %35 = vector.broadcast %34 : vector<1x256xf32> to vector<8x256xf32>
    %36 = arith.mulf %32, %35 : vector<8x256xf32>
    %c239_i32 = arith.constant 239 : i32
    %37 = tpu.dynamic_rotate %1 by %c239_i32 dim 1 : vector<8x256xf32>, i32 -> vector<8x256xf32>
    %c8 = arith.constant 8 : index
    %c0_17 = arith.constant 0 : index
    %c0_18 = arith.constant 0 : index
    %38 = vector.load %arg4[%c8, %c0_17, %c0_18] : memref<9x1x256xf32, #tpu.memory_space<vmem>>, vector<1x1x256xf32>
    %39 = vector.shape_cast %38 : vector<1x1x256xf32> to vector<1x256xf32>
    %40 = vector.broadcast %39 : vector<1x256xf32> to vector<8x256xf32>
    %41 = arith.mulf %37, %40 : vector<8x256xf32>
    %42 = tpu.concatenate %6, %11, %16, %21, %1, %26, %31, %36, %41 in 0 : vector<8x256xf32>, vector<8x256xf32>, vector<8x256xf32>, vector<8x256xf32>, vector<8x256xf32>, vector<8x256xf32>, vector<8x256xf32>, vector<8x256xf32>, vector<8x256xf32> -> vector<72x256xf32>
    %c0_19 = arith.constant 0 : index
    %c0_20 = arith.constant 0 : index
    %43 = vector.load %arg2[%c0_19, %c0_20] : memref<18x72xf32, #tpu.memory_space<vmem>>, vector<18x72xf32>
    %cst = arith.constant dense<0.000000e+00> : vector<18x256xf32>
    %44 = tpu.matmul %43, %42, %cst {dimension_numbers = #tpu.dot_dimension_numbers<[1], [0], [0], [1], [0, 0, 1, 1], [], []>} : vector<18x72xf32>, vector<72x256xf32>, vector<18x256xf32> -> vector<18x256xf32>
    %c0_21 = arith.constant 0 : index
    %c0_22 = arith.constant 0 : index
    %45 = vector.load %arg3[%c0_21, %c0_22] : memref<18x1xf32, #tpu.memory_space<vmem>>, vector<18x1xf32>
    %46 = vector.broadcast %45 : vector<18x1xf32> to vector<18x256xf32>
    %47 = arith.addf %44, %46 : vector<18x256xf32>
    %48 = vector.extract_strided_slice %47 {offsets = [0, 0], sizes = [12, 256], strides = [1, 1]} : vector<18x256xf32> to vector<12x256xf32>
    %c0_23 = arith.constant 0 : index
    %c0_24 = arith.constant 0 : index
    %c0_25 = arith.constant 0 : index
    %49 = vector.load %arg5[%c0_23, %c0_24, %c0_25] : memref<1x12x256xf32, #tpu.memory_space<vmem>>, vector<1x12x256xf32>
    %50 = vector.shape_cast %49 : vector<1x12x256xf32> to vector<12x256xf32>
    %51 = vector.shape_cast %48 : vector<12x256xf32> to vector<1x12x256xf32>
    tpu.vector_store %arg5[%c0_23, %c0_24, %c0_25], %51 {strides = array<i32>} : memref<1x12x256xf32, #tpu.memory_space<vmem>>, vector<1x12x256xf32>,
    %52 = vector.extract_strided_slice %47 {offsets = [12, 0], sizes = [6, 256], strides = [1, 1]} : vector<18x256xf32> to vector<6x256xf32>
    %c0_26 = arith.constant 0 : index
    %c0_27 = arith.constant 0 : index
    %c0_28 = arith.constant 0 : index
    %53 = vector.load %arg6[%c0_26, %c0_27, %c0_28] : memref<1x6x256xf32, #tpu.memory_space<vmem>>, vector<1x6x256xf32>
    %54 = vector.shape_cast %53 : vector<1x6x256xf32> to vector<6x256xf32>
    %55 = vector.shape_cast %52 : vector<6x256xf32> to vector<1x6x256xf32>
    tpu.vector_store %arg6[%c0_26, %c0_27, %c0_28], %55 {strides = array<i32>} : memref<1x6x256xf32, #tpu.memory_space<vmem>>, vector<1x6x256xf32>,
    return
  }
  func.func @transform_0(%arg0: i32) -> (i32, i32, i32) {
    %c0_i32 = arith.constant 0 : i32
    %c0_i32_0 = arith.constant 0 : i32
    %c0_i32_1 = arith.constant 0 : i32
    return %arg0, %c0_i32, %c0_i32_0 : i32, i32, i32
  }
  func.func @transform_1(%arg0: i32) -> (i32, i32) {
    %c0_i32 = arith.constant 0 : i32
    %c0_i32_0 = arith.constant 0 : i32
    %c0_i32_1 = arith.constant 0 : i32
    return %c0_i32, %c0_i32_0 : i32, i32
  }
  func.func @transform_2(%arg0: i32) -> (i32, i32) {
    %c0_i32 = arith.constant 0 : i32
    %c0_i32_0 = arith.constant 0 : i32
    %c0_i32_1 = arith.constant 0 : i32
    return %c0_i32, %c0_i32_0 : i32, i32
  }
  func.func @transform_3(%arg0: i32) -> (i32, i32, i32) {
    %c0_i32 = arith.constant 0 : i32
    %c0_i32_0 = arith.constant 0 : i32
    %c0_i32_1 = arith.constant 0 : i32
    %c0_i32_2 = arith.constant 0 : i32
    return %c0_i32, %c0_i32_0, %c0_i32_1 : i32, i32, i32
  }
  func.func @transform_4(%arg0: i32) -> (i32, i32, i32) {
    %c0_i32 = arith.constant 0 : i32
    %c0_i32_0 = arith.constant 0 : i32
    %c0_i32_1 = arith.constant 0 : i32
    return %arg0, %c0_i32, %c0_i32_0 : i32, i32, i32
  }
  func.func @transform_5(%arg0: i32) -> (i32, i32, i32) {
    %c0_i32 = arith.constant 0 : i32
    %c0_i32_0 = arith.constant 0 : i32
    %c0_i32_1 = arith.constant 0 : i32
    return %arg0, %c0_i32, %c0_i32_0 : i32, i32, i32
  }
}

</mosaic_0001>

<bundles_post_ra>
// kernel: rpn_forward.1
= control target key start
LH: loop header
LB: loop body
LE: loop exit
PB: predicated region body
PF: predicated region fallthrough
CT: control target
= control target key end

     0   :  { %s673_s18 = smov 0   ;;  %s785_s0 = inlined_call_operand.vmem [shape: f32[2,8,256], index: 0, kind: input, shape index: {}]   ;;  %s786_s1 = inlined_call_operand.vmem [shape: f32[18,72], index: 1, kind: input, shape index: {}]   ;;  %s787_s2 = inlined_call_operand.vmem [shape: f32[18,1], index: 2, kind: input, shape index: {}]   ;;  %s788_s3 = inlined_call_operand.vmem [shape: f32[9,1,256], index: 3, kind: input, shape index: {}]   ;;  %s789_s4 = inlined_call_operand.vmem [shape: f32[2,12,256], index: 4, kind: output, shape index: {0}]   ;;  %s790_s5 = inlined_call_operand.vmem [shape: f32[2,6,256], index: 5, kind: output, shape index: {1}]  }
   0x1 LB: > { %s559_s19 = sadd.s32 4294967295, %s632_s18   ;;  %p563_p0 = scmp.ge.s32.totalorder %s632_s18, 1  ;;  %s632_s18 = sphi %s673_s18, %s16_s18  }
   0x2   : > { %p190_p1 = scmp.lt.s32.totalorder %s632_s18, 3 }
   0x4   : > { %p191_p2 = pnand %p563_p0, %p190_p1 }
   0x5   : > { %p223_p3 = scmp.lt.s32.totalorder (!%p191_p2), %s559_s19, 1  ;;  %s634_s24 = smov (!%p191_p2), 112  }
   0x6   : > { %194 = sbr.rel (%p191_p2) target bundleno = 322 (0x142), region = 36  ;;  %s635_s25 = smov (!%p191_p2), 111  }
   0x7   : > { %s636_s26 = smov (!%p191_p2), 113   ;;  %s637_s27 = smov (!%p191_p2), 127  }
   0x8   : > { %s638_s28 = smov (!%p191_p2), 1   ;;  %s639_s29 = smov (!%p191_p2), 15  }
   0x9   : > { %s640_s30 = smov (!%p191_p2), 16   ;;  %s641_s6 = smov (!%p191_p2), 17  }
   0xb   : > { %s792_s19 = smov (!%p223_p3, %s559_s19), 1  ;;  %v244_v3 = vlaneseq  ;;  %v576_v7 = vld [vmem:[%s788_s3 + $0x10] sm:$0x3]  ;;  %v575_v9 = vld [vmem:[%s788_s3 + $0xe] sm:$0x3]  ;;  %v372_v49 = vld [vmem:[%s787_s2] sm:$0xff] }
   0xc   : > { %s585_s20 = sshll.u32 %s792_s19, 4  ;;  %v363_v10 = vperm.slane %v576_v7, 0  ;;  %v364_v11 = vperm.slane %v576_v7, 1  ;;  %v574_v12 = vld [vmem:[%s788_s3 + $0xc] sm:$0x3]  ;;  %v347_v15 = vperm.slane %v575_v9, 0 }
   0xd   : > { %s227_s23 = scalar_lea.vmem %s785_s0, %s585_s20  ;;  %v709_v6 = vand.u32 127, %v244_v3  ;;  %v348_v19 = vperm.slane %v575_v9, 1  ;;  %v331_v23 = vperm.slane %v574_v12, 0  ;;  %v332_v25 = vperm.slane %v574_v12, 1  ;;  %v573_v26 = vld [vmem:[%s788_s3 + $0xa] sm:$0x3]  ;;  %s237_s22 = scalar_lea.vmem %s790_s5, %s585_s20 }
   0xe   : > { %v689_v0 = vld [vmem:[%s227_s23] sm:$0xff]  ;;  %v694_v1 = vld [vmem:[%s227_s23 + $0x8] sm:$0xff]  ;;  %v315_v32 = vperm.slane %v573_v26, 0  ;;  %v316_v33 = vperm.slane %v573_v26, 1  ;;  %v642_v52 = vmov 0   ;;  %vm390_vm8 = vcmask 588800  }
   0xf   : > { %337 = vrot.lane.b32.xlu1 %v689_v0, %s634_s24  ;;  %353 = vrot.lane.b32.xlu0 %v689_v0, %s635_s25  ;;  %vm341_vm0 = vcmp.lt.s32.totalorder %v709_v6, 112  ;;  %vm357_vm1 = vcmp.lt.s32.totalorder %v709_v6, 111  ;;  %vm325_vm2 = vcmp.lt.s32.totalorder %v709_v6, 113  ;;  %vm309_vm3 = vcmp.lt.s32.totalorder %v709_v6, 127  ;;  %v572_v41 = vld [vmem:[%s788_s3 + $0x6] sm:$0x3] }
  0x10   : > { %321 = vrot.lane.b32.xlu2 %v689_v0, %s636_s26  ;;  %v571_v42 = vld [vmem:[%s788_s3 + $0x4] sm:$0x3]  ;;  %vm293_vm4 = vcmp.lt.s32.totalorder %v709_v6, 1  ;;  %v299_v43 = vperm.slane %v572_v41, 0  ;;  %v300_v44 = vperm.slane %v572_v41, 1  ;;  %vm277_vm5 = vcmp.lt.s32.totalorder %v709_v6, 15  ;;  %623 = vset.pattern.permute.xlu1 %v642_v52 }
  0x11   : > { %v283_v46 = vperm.slane %v571_v42, 0  ;;  %v373_v47 = vld [vmem:[%s787_s2 + $0x8] sm:$0xff]  ;;  %v284_v48 = vperm.slane %v571_v42, 1  ;;  %625 = vset.pattern.permute.xlu0 %v642_v52  ;;  %v570_v61 = vld [vmem:[%s788_s3 + $0x2] sm:$0x3]  ;;  %624 = vset.pattern.permute.xlu2 %v642_v52  ;;  %vm261_vm6 = vcmp.lt.s32.totalorder %v709_v6, 16 }
  0x12   : > { %v374_v62 = vld [vmem:[%s787_s2 + $0x10] sm:$0x3]  ;;  %v267_v63 = vperm.slane %v570_v61, 0  ;;  %vm246_vm7 = vcmp.lt.s32.totalorder %v709_v6, 17  ;;  %s586_s13 = sshll.u32 %s792_s19, 5  ;;  %vm460_vm9 = vcmask 1043456  }
  0x13   : > { %v371_v6 = vld [vmem:[%s786_s1 + $0x10] sm:$0x3]  ;;  %s232_s16 = scalar_lea.vmem %s789_s4, %s586_s13 }
  0x17   : > { %339 = vrot.lane.b32.xlu1 %v694_v1, %s634_s24  ;;  %355 = vrot.lane.b32.xlu0 %v694_v1, %s635_s25 }
  0x18   : > { %323 = vrot.lane.b32.xlu2 %v694_v1, %s636_s26 }
  0x1f   : > { %307 = vrot.lane.b32.xlu1 %v694_v1, %s637_s27  ;;  %305 = vrot.lane.b32.xlu0 %v689_v0, %s637_s27 }
  0x20   : > { %289 = vrot.lane.b32.xlu2 %v689_v0, %s638_s28 }
  0x27   : > { %273 = vrot.lane.b32.xlu1 %v689_v0, %s639_s29  ;;  %291 = vrot.lane.b32.xlu0 %v694_v1, %s638_s28 }
  0x28   : > { %275 = vrot.lane.b32.xlu2 %v694_v1, %s639_s29 }
  0x2f   : > { %259 = vrot.lane.b32.xlu1 %v694_v1, %s640_s30  ;;  %257 = vrot.lane.b32.xlu0 %v689_v0, %s640_s30 }
  0x30   : > { %240 = vrot.lane.b32.xlu2 %v689_v0, %s641_s6 }
  0x37   : > { %242 = vrot.lane.b32.xlu0 %v694_v1, %s641_s6  ;;  %382 = vperm.xlu1 %623, %v373_v47  }
  0x38   : > { %387 = vperm.xlu2 %624, %v374_v62  }
  0x3f   : > { %377 = vperm.xlu0 %625, %v372_v49  }
  0x6a   : > { %v322_v2 = vpop.permute.xlu2 %321 }
  0x72   : > { %v324_v8 = vpop.permute.xlu2 %323 }
  0x73   : > { %v326_v24 = vsel %vm325_vm2, %v322_v2, %v324_v8  ;;  %v327_v27 = vsel %vm325_vm2, %v324_v8, %v322_v2  ;;  %v249_v8 = vld [vmem:[%s788_s3] sm:$0x3] }
  0x74   : > { %v335_v31 = vmul.f32 %v331_v23, %v326_v24  ;;  %v336_v34 = vmul.f32 %v332_v25, %v327_v27 }
  0x7a   : > { %v290_v29 = vpop.permute.xlu2 %289 }
  0x81   : > { %v338_v4 = vpop.permute.xlu1 %337  ;;  %v354_v5 = vpop.permute.xlu0 %353 }
  0x82   : > { %v276_v45 = vpop.permute.xlu2 %275 }
  0x89   : > { %v340_v13 = vpop.permute.xlu1 %339  ;;  %v356_v14 = vpop.permute.xlu0 %355 }
  0x8a   : > { %v342_v16 = vsel %vm341_vm0, %v338_v4, %v340_v13  ;;  %v358_v17 = vsel %vm357_vm1, %v354_v5, %v356_v14  ;;  %v359_v18 = vsel %vm357_vm1, %v356_v14, %v354_v5  ;;  %v343_v20 = vsel %vm341_vm0, %v340_v13, %v338_v4  ;;  %v241_v9 = vpop.permute.xlu2 %240 }
  0x8b   : > { %v367_v21 = vmul.f32 %v363_v10, %v358_v17  ;;  %v368_v22 = vmul.f32 %v364_v11, %v359_v18  ;;  %v351_v28 = vmul.f32 %v347_v15, %v342_v16  ;;  %v352_v30 = vmul.f32 %v348_v19, %v343_v20  ;;  %v370_v17 = vld [vmem:[%s786_s1 + $0x8] sm:$0xff]  ;;  %v369_v18 = vld [vmem:[%s786_s1] sm:$0xff] }
  0x8c   : > { %v251_v10 = vperm.slane %v249_v8, 0  ;;  %v252_v11 = vperm.slane %v249_v8, 1 }
  0x8d   : > { %407 = vmatpush.msra.mxu0 %v367_v21  ;;  %588 = vmatpush.msra.mxu2 %v367_v21 }
  0x8e   : > { %433 = vmatpush.msra.mxu1 %v368_v22  ;;  %597 = vmatpush.msra.mxu3 %v368_v22 }
  0x8f   : > { %408 = vmatpush.msra.mxu0 %v351_v28  ;;  %589 = vmatpush.msra.mxu2 %v351_v28 }
  0x90   : > { %434 = vmatpush.msra.mxu1 %v352_v30  ;;  %598 = vmatpush.msra.mxu3 %v352_v30 }
  0x91   : > { %v308_v35 = vpop.permute.xlu1 %307  ;;  %409 = vmatpush.msra.mxu0 %v335_v31  ;;  %590 = vmatpush.msra.mxu2 %v335_v31  ;;  %v306_v36 = vpop.permute.xlu0 %305 }
  0x92   : > { %435 = vmatpush.msra.mxu1 %v336_v34  ;;  %599 = vmatpush.msra.mxu3 %v336_v34  ;;  %v310_v37 = vsel %vm309_vm3, %v306_v36, %v308_v35  ;;  %v311_v38 = vsel %vm309_vm3, %v308_v35, %v306_v36 }
  0x93   : > { %v319_v39 = vmul.f32 %v315_v32, %v310_v37  ;;  %v320_v40 = vmul.f32 %v316_v33, %v311_v38 }
  0x95   : > { %410 = vmatpush.msra.mxu0 %v319_v39  ;;  %591 = vmatpush.msra.mxu2 %v319_v39 }
  0x96   : > { %436 = vmatpush.msra.mxu1 %v320_v40  ;;  %600 = vmatpush.msra.mxu3 %v320_v40 }
  0x97   : > { %411 = vmatpush.msra.mxu0 %v689_v0  ;;  %592 = vmatpush.msra.mxu2 %v689_v0  ;;  %v268_v0 = vperm.slane %v570_v61, 1 }
  0x98   : > { %437 = vmatpush.msra.mxu1 %v694_v1  ;;  %601 = vmatpush.msra.mxu3 %v694_v1 }
  0x99   : > { %v274_v50 = vpop.permute.xlu1 %273  ;;  %v292_v51 = vpop.permute.xlu0 %291 }
  0x9a   : > { %v294_v53 = vsel %vm293_vm4, %v290_v29, %v292_v51  ;;  %v295_v54 = vsel %vm293_vm4, %v292_v51, %v290_v29  ;;  %v278_v55 = vsel %vm277_vm5, %v274_v50, %v276_v45  ;;  %v279_v56 = vsel %vm277_vm5, %v276_v45, %v274_v50  ;;  %v388_v29 = vpop.permute.xlu2 %387 }
  0x9b   : > { %v303_v57 = vmul.f32 %v299_v43, %v295_v54  ;;  %v304_v58 = vmul.f32 %v300_v44, %v294_v53  ;;  %v287_v59 = vmul.f32 %v283_v46, %v279_v56  ;;  %v288_v60 = vmul.f32 %v284_v48, %v278_v55 }
  0x9d   : > { %412 = vmatpush.msra.mxu0 %v303_v57  ;;  %593 = vmatpush.msra.mxu2 %v303_v57 }
  0x9e   : > { %438 = vmatpush.msra.mxu1 %v304_v58  ;;  %602 = vmatpush.msra.mxu3 %v304_v58 }
  0x9f   : > { %413 = vmatpush.msra.mxu0 %v287_v59  ;;  %594 = vmatpush.msra.mxu2 %v287_v59 }
  0xa0   : > { %439 = vmatpush.msra.mxu1 %v288_v60  ;;  %603 = vmatpush.msra.mxu3 %v288_v60 }
  0xa1   : > { %v260_v1 = vpop.permute.xlu1 %259  ;;  %v258_v2 = vpop.permute.xlu0 %257 }
  0xa2   : > { %v262_v3 = vsel %vm261_vm6, %v258_v2, %v260_v1  ;;  %v263_v4 = vsel %vm261_vm6, %v260_v1, %v258_v2 }
  0xa3   : > { %v271_v5 = vmul.f32 %v267_v63, %v263_v4  ;;  %v272_v7 = vmul.f32 %v268_v0, %v262_v3 }
  0xa5   : > { %414 = vmatpush.msra.mxu0 %v271_v5  ;;  %595 = vmatpush.msra.mxu2 %v271_v5 }
  0xa6   : > { %440 = vmatpush.msra.mxu1 %v272_v7  ;;  %604 = vmatpush.msra.mxu3 %v272_v7 }
  0xa9   : > { %v243_v12 = vpop.permute.xlu0 %242  ;;  %v383_v24 = vpop.permute.xlu1 %382 }
  0xaa   : > { %v247_v13 = vsel %vm246_vm7, %v241_v9, %v243_v12  ;;  %v248_v14 = vsel %vm246_vm7, %v243_v12, %v241_v9 }
  0xab   : > { %v255_v15 = vmul.f32 %v251_v10, %v248_v14  ;;  %v256_v16 = vmul.f32 %v252_v11, %v247_v13 }
  0xad   : > { %415 = vmatpush.msra.mxu0 %v255_v15  ;;  %596 = vmatpush.msra.mxu2 %v255_v15 }
  0xae   : > { %441 = vmatpush.msra.mxu1 %v256_v16  ;;  %605 = vmatpush.msra.mxu3 %v256_v16 }
  0xaf   : > { %578 = vmatmul.msk.f32.vlgmr.msra.gmra.mxu2 %vm390_vm8, %v370_v17  ;;  %581 = vmatmul.msk.f32.vlgmr.msra.gmra.mxu3 %vm390_vm8, %v370_v17 }
  0xb0   : > { %577 = vmatmul.msk.f32.vlgmr.msra.gmra.mxu0 %vm390_vm8, %v369_v18  ;;  %580 = vmatmul.msk.f32.vlgmr.msra.gmra.mxu1 %vm390_vm8, %v369_v18 }
  0xb1   : > { %v378_v19 = vpop.permute.xlu0 %377 }
  0xb7   : > { %579 = vmatmul.msk.f32.gmra.mxu2 %vm390_vm8, %v371_v6  ;;  %582 = vmatmul.msk.f32.gmra.mxu3 %vm390_vm8, %v371_v6 }
 0x12d   : > { %v417_v20 = vpop.f32.mrf.mxu0  ;;  %v443_v21 = vpop.f32.mrf.mxu1 }
 0x12e   : > { %v418_v22 = vadd.f32 %v417_v20, %v378_v19  ;;  %v444_v23 = vadd.f32 %v443_v21, %v378_v19 }
 0x130   : > { %452 = vst [vmem:[%s232_s16] sm:$0xff] %v418_v22 }
 0x131   : > { %453 = vst [vmem:[%s232_s16 + $0x8] sm:$0xff] %v444_v23 }
 0x132   : > { %v420_v25 = vpop.f32.mrf.mxu2  ;;  %v446_v26 = vpop.f32.mrf.mxu3 }
 0x133   : > { %v421_v27 = vadd.f32 %v420_v25, %v383_v24  ;;  %v447_v28 = vadd.f32 %v446_v26, %v383_v24 }
 0x135   : > { %454 = vst [vmem:[%s232_s16 + $0x10] sm:$0xf] %v421_v27  ;;  %v461_v34 = vrot.slane %v421_v27, 4  ;;  %v464_v35 = vrot.slane %v447_v28, 4 }
 0x136   : > { %455 = vst [vmem:[%s232_s16 + $0x18] sm:$0xf] %v447_v28 }
 0x13a   : > { %v423_v30 = vpop.f32.mrf.mxu2  ;;  %v449_v31 = vpop.f32.mrf.mxu3 }
 0x13b   : > { %v424_v32 = vadd.f32 %v423_v30, %v388_v29  ;;  %v450_v33 = vadd.f32 %v449_v31, %v388_v29 }
 0x13d   : > { %v462_v36 = vrot.slane %v424_v32, 4  ;;  %v465_v37 = vrot.slane %v450_v33, 4 }
 0x13f   : > { %v463_v38 = vsel %vm460_vm9, %v461_v34, %v462_v36  ;;  %v466_v39 = vsel %vm460_vm9, %v464_v35, %v465_v37 }
 0x140   : > { %469 = vst [vmem:[%s237_s22] sm:$0x3f] %v463_v38 }
 0x141   : > { %470 = vst [vmem:[%s237_s22 + $0x8] sm:$0x3f] %v466_v39 }
 0x142 PF: > { %s16_s18 = sadd.s32 1, %s632_s18  }
 0x143   : > { %p13_p4 = scmp.ge.s32.totalorder %s16_s18, 4  }
 0x145   :  { %15 = sbr.rel (!%p13_p4) target bundleno = 1 (0x1), region = 85 }

</bundles_post_ra>
